<compile_context>
chip_gen: v6e
topology: v6e:2x2x1
jax: 0.10.0
libtpu: 0.0.40
codegen_flags: <defaults>
</compile_context>

<pallas_src>
import math
from functools import partial

import jax
import jax.numpy as jnp
from jax.experimental import pallas as pl
from jax.experimental.pallas import tpu as pltpu


# --------------------------------------------------------------------------
# Kernel A: per-(b,h) sparsity measure, K-tiled.
#   M[q] = max_s Q[q].K[idx[q,s]] - mean_s Q[q].K[idx[q,s]]
# Scores are computed transposed (tk, L_Q) so queries sit on the lane axis and
# the per-tile reductions / final M store are lane-dense.
# --------------------------------------------------------------------------
def _prob_qk_m_kernel(q_ref, k_ref, idx_ref, m_ref, m_max_sc, m_sum_sc, *, u_part):
    kt = pl.program_id(2)
    l_q = q_ref.shape[2]
    tk = k_ref.shape[2]

    @pl.when(kt == 0)
    def _init():
        m_max_sc[...] = jnp.full_like(m_max_sc, -jnp.inf)
        m_sum_sc[...] = jnp.zeros_like(m_sum_sc)

    q = q_ref[0, 0]                       # (L_Q, D)  bf16
    k = k_ref[0, 0]                       # (tk,  D)  bf16

    # Transposed scores for this K tile: (tk, L_Q), f32 accumulation on MXU.
    st = jax.lax.dot_general(k, q, (((1,), (1,)), ((), ())),
                             preferred_element_type=jnp.float32)

    # Per-(key, query) sample counts for this tile:
    #   C[k, q] = #{s : idx[s, q] == global_key_index(k)}
    k_iota = kt * tk + jax.lax.broadcasted_iota(jnp.int32, (tk, l_q), 0)

    def body(s, c):
        row = idx_ref[pl.ds(s, 1), :]     # (1, L_Q) int32
        return c + (k_iota == row).astype(jnp.float32)

    cmat = jax.lax.fori_loop(0, u_part, body,
                             jnp.zeros((tk, l_q), jnp.float32), unroll=True)

    # Duplicate samples are weighted by their count in the sum (matches torch's
    # gather semantics); the max only needs "sampled at least once".  Every
    # query has u_part >= 1 samples globally, so the final max is finite.
    m_sum_sc[...] = m_sum_sc[...] + jnp.sum(st * cmat, axis=0, keepdims=True)
    m_max_sc[...] = jnp.maximum(
        m_max_sc[...],
        jnp.max(jnp.where(cmat > 0.0, st, -jnp.inf), axis=0, keepdims=True))

    @pl.when(kt == pl.num_programs(2) - 1)
    def _finalize():
        m_ref[0, 0] = m_max_sc[...] - m_sum_sc[...] * (1.0 / float(u_part))


# --------------------------------------------------------------------------
# Kernel B: per-(b,h) -- scaled scores for the (wrapper-gathered) top queries,
# ProbMask (causal), softmax, attn@V, scatter the updated rows into the
# (wrapper-computed) cumsum initial context.
# --------------------------------------------------------------------------
def _context_kernel(qr_ref, k_ref, v_ref, ctx_ref, idxc_ref, idxr_ref, o_ref, *, scale):
    n_top = qr_ref.shape[2]
    l_k = k_ref.shape[2]
    l_q = o_ref.shape[2]

    q_red = qr_ref[0, 0]                  # (n_top, D) bf16 (top queries)
    k = k_ref[0, 0]                       # (L_K, D)   bf16
    v = v_ref[0, 0]                       # (L_V, D)   bf16
    ctx0 = ctx_ref[0, 0]                  # (L_Q, D)   f32   cumsum(V) context
    idx_col = idxc_ref[0, 0]              # (n_top, 1) int32
    idx_row = idxr_ref[0, 0]              # (1, n_top) int32

    # Scores for the selected queries, scaled, then ProbMask (j > query pos).
    scores = jax.lax.dot_general(q_red, k, (((1,), (1,)), ((), ())),
                                 preferred_element_type=jnp.float32) * scale
    kj = jax.lax.broadcasted_iota(jnp.int32, (n_top, l_k), 1)
    scores = jnp.where(kj > idx_col, -jnp.inf, scores)

    # Softmax over keys (EUP reciprocal for the denominator) and attn @ V.
    smax = jnp.max(scores, axis=-1, keepdims=True)
    p = jnp.exp(scores - smax)
    attn = p * pl.reciprocal(jnp.sum(p, axis=-1, keepdims=True), approx=True)
    upd = jnp.dot(attn.astype(v.dtype), v,
                  preferred_element_type=jnp.float32)              # (n_top, D)

    # Scatter the updated rows into the initial context (top-k ids distinct).
    ohT = (jax.lax.broadcasted_iota(jnp.int32, (l_q, n_top), 0) == idx_row)
    scattered = jnp.dot(ohT.astype(v.dtype), upd.astype(v.dtype),
                        preferred_element_type=jnp.float32)        # (L_Q, D)
    cnt = jnp.sum(ohT.astype(jnp.float32), axis=1, keepdims=True)  # (L_Q, 1)
    o_ref[0, 0] = jnp.where(cnt > 0.5, scattered, ctx0).astype(o_ref.dtype)


# --------------------------------------------------------------------------
# Wrapper (glue): transposes + bf16 cast, U_part/n_top, sampling indices,
# top-k selection, top-query gather, initial-context cumsum.
# --------------------------------------------------------------------------
def _pick_k_tile(l_k, max_tile=512):
    if l_k <= max_tile:
        return l_k
    for t in (512, 256, 128, 64, 32, 16, 8):
        if l_k % t == 0:
            return t
    return l_k


def prob_attention_forward(queries, keys, values, attn_mask=None, *,
                           factor=5, scale=None, sample_key=None,
                           return_aux=False):
    del attn_mask  # mask_flag=True rebuilds the ProbMask internally (as torch does)
    B, L_Q, H, D = queries.shape
    _, L_K, _, _ = keys.shape
    _, L_V, _, _ = values.shape
    assert L_Q == L_V, "mask_flag=True path requires L_Q == L_V"

    # bf16 operands for the MXU matmuls; accumulation stays f32 in-kernel.
    q = jnp.transpose(queries, (0, 2, 1, 3)).astype(jnp.bfloat16)
    k = jnp.transpose(keys, (0, 2, 1, 3)).astype(jnp.bfloat16)
    v = jnp.transpose(values, (0, 2, 1, 3)).astype(jnp.bfloat16)

    U_part = min(int(factor * math.ceil(math.log(L_K))), L_K)
    n_top = min(int(factor * math.ceil(math.log(L_Q))), L_Q)

    if sample_key is None:
        sample_key = jax.random.PRNGKey(0)
    # analogue of torch.rand((L_Q, sample_k)) * L_K -> int indices in [0, L_K)
    idx_sample = (jax.random.uniform(sample_key, (L_Q, U_part)) * L_K).astype(jnp.int32)
    idx_sample_t = idx_sample.T                                  # (U_part, L_Q)

    tk = _pick_k_tile(L_K)
    n_kt = L_K // tk

    # ---- kernel A: sparsity measure M (lane-dense output (B,H,1,L_Q)) ----
    m = pl.pallas_call(
        partial(_prob_qk_m_kernel, u_part=U_part),
        out_shape=jax.ShapeDtypeStruct((B, H, 1, L_Q), jnp.float32),
        grid_spec=pltpu.PrefetchScalarGridSpec(
            num_scalar_prefetch=0,
            grid=(B, H, n_kt),
            in_specs=[
                pl.BlockSpec((1, 1, L_Q, D), lambda b, h, kt: (b, h, 0, 0)),
                pl.BlockSpec((1, 1, tk, D), lambda b, h, kt: (b, h, kt, 0)),
                pl.BlockSpec((U_part, L_Q), lambda b, h, kt: (0, 0)),
            ],
            out_specs=pl.BlockSpec((1, 1, 1, L_Q), lambda b, h, kt: (b, h, 0, 0)),
            scratch_shapes=[pltpu.VMEM((1, L_Q), jnp.float32),
                            pltpu.VMEM((1, L_Q), jnp.float32)],
        ),
        compiler_params=pltpu.CompilerParams(
            dimension_semantics=("parallel", "parallel", "arbitrary")),
    )(q, k, idx_sample_t)
    m = m[:, :, 0, :]                                            # (B, H, L_Q)

    # ---- top-k query selection (glue) ----
    # TODO(synk): top-k selection stays in plain JAX (jax.lax.top_k).
    _, index = jax.lax.top_k(m, n_top)                           # (B, H, n_top)
    index = index.astype(jnp.int32)
    idx_col = index[..., None]                                   # (B, H, n_top, 1)
    idx_row = index[:, :, None, :]                               # (B, H, 1, n_top)

    # Wrapper-side gather of the selected queries (tiny) and initial context.
    q_red = jnp.take_along_axis(
        q, jnp.broadcast_to(index[..., None], (B, H, n_top, D)), axis=2)
    # TODO(synk): the initial-context cumsum stays in XLA (jnp.cumsum); an
    # in-kernel blockwise scan would save one context-sized HBM round trip.
    ctx_init = jnp.cumsum(v.astype(jnp.float32), axis=2)         # (B,H,L_Q,D) f32

    sc = float(scale) if scale is not None else 1.0 / math.sqrt(D)

    # ---- kernel B: masked softmax(QK)@V for the top queries + scatter ----
    context = pl.pallas_call(
        partial(_context_kernel, scale=sc),
        out_shape=jax.ShapeDtypeStruct((B, H, L_Q, D), jnp.float32),
        grid_spec=pltpu.PrefetchScalarGridSpec(
            num_scalar_prefetch=0,
            grid=(B, H),
            in_specs=[
                pl.BlockSpec((1, 1, n_top, D), lambda b, h: (b, h, 0, 0)),
                pl.BlockSpec((1, 1, L_K, D), lambda b, h: (b, h, 0, 0)),
                pl.BlockSpec((1, 1, L_V, D), lambda b, h: (b, h, 0, 0)),
                pl.BlockSpec((1, 1, L_Q, D), lambda b, h: (b, h, 0, 0)),
                pl.BlockSpec((1, 1, n_top, 1), lambda b, h: (b, h, 0, 0)),
                pl.BlockSpec((1, 1, 1, n_top), lambda b, h: (b, h, 0, 0)),
            ],
            out_specs=pl.BlockSpec((1, 1, L_Q, D), lambda b, h: (b, h, 0, 0)),
        ),
        compiler_params=pltpu.CompilerParams(
            dimension_semantics=("parallel", "parallel")),
    )(q_red, k, v, ctx_init, idx_col, idx_row)

    # output_attention=False -> attention map is None.
    if return_aux:
        return context, None, dict(m=m, index=index, idx_sample=idx_sample, scale=sc)
    return context, None


# --------------------------------------------------------------------------
# Pure-JAX reference (correctness sanity check; shares index / idx_sample and
# mirrors the kernel's bf16-rounded operands).
# --------------------------------------------------------------------------
def _reference(queries, keys, values, idx_sample, index, scale):
    q = jnp.transpose(queries, (0, 2, 1, 3)).astype(jnp.bfloat16).astype(jnp.float32)
    k = jnp.transpose(keys, (0, 2, 1, 3)).astype(jnp.bfloat16).astype(jnp.float32)
    v = jnp.transpose(values, (0, 2, 1, 3)).astype(jnp.bfloat16).astype(jnp.float32)
    B, H, L_Q, D = q.shape
    L_K = k.shape[2]
    n_top = index.shape[-1]

    scores_full = jnp.einsum('bhqd,bhkd->bhqk', q, k,
                             precision=jax.lax.Precision.HIGHEST)
    gat = jnp.take_along_axis(
        scores_full,
        jnp.broadcast_to(idx_sample[None, None], (B, H) + idx_sample.shape),
        axis=3)
    m_ref = gat.max(-1) - gat.mean(-1)

    sc_top = jnp.take_along_axis(
        scores_full,
        jnp.broadcast_to(index[..., None], (B, H, n_top, L_K)),
        axis=2) * scale
    kj = jnp.arange(L_K)[None, None, None, :]
    sc_top = jnp.where(kj > index[..., None], -jnp.inf, sc_top)
    attn = jax.nn.softmax(sc_top, axis=-1)
    upd = jnp.einsum('bhnk,bhkd->bhnd', attn, v,
                     precision=jax.lax.Precision.HIGHEST)

    ctx = jnp.cumsum(v, axis=2)
    b_ar = jnp.arange(B)[:, None, None]
    h_ar = jnp.arange(H)[None, :, None]
    ctx = ctx.at[b_ar, h_ar, index, :].set(upd)
    return m_ref, ctx


if __name__ == "__main__":
    key = jax.random.PRNGKey(0)
    kq, kk, kv, ks = jax.random.split(key, 4)

    B, L, H, D = 2, 16, 4, 32   # (B, L_Q=L_K=L_V, H, D) as in the torch forward
    queries = jax.random.normal(kq, (B, L, H, D), dtype=jnp.float32)
    keys_in = jax.random.normal(kk, (B, L, H, D), dtype=jnp.float32)
    values = jax.random.normal(kv, (B, L, H, D), dtype=jnp.float32)

    context, attn, aux = prob_attention_forward(
        queries, keys_in, values, factor=5, scale=None,
        sample_key=ks, return_aux=True)
    context = jax.block_until_ready(context)

    # sanity check against a pure-JAX reference (same sampled indices / top-k)
    m_ref, ctx_ref = _reference(queries, keys_in, values,
                                aux["idx_sample"], aux["index"], aux["scale"])
    m_err = float(jnp.max(jnp.abs(aux["m"] - m_ref)))
    c_err = float(jnp.max(jnp.abs(context - ctx_ref)))
    assert m_err < 2e-2, f"M mismatch: {m_err}"
    assert c_err < 1e-1, f"context mismatch: {c_err}"
    assert context.shape == (B, H, L, D)
    assert attn is None

    print("KERNEL_OK")
</pallas_src>

<mosaic_0001>
module attributes {stable_mosaic.version = 11 : i64} {
  func.func @_prob_qk_m_kernel(%arg0: i32, %arg1: i32, %arg2: i32, %arg3: memref<1x1x16x32xbf16, #tpu.memory_space<vmem>>, %arg4: memref<1x1x16x32xbf16, #tpu.memory_space<vmem>>, %arg5: memref<15x16xi32, #tpu.memory_space<vmem>>, %arg6: memref<1x1x1x16xf32, #tpu.memory_space<vmem>>, %arg7: memref<1x16xf32, #tpu.memory_space<vmem>>, %arg8: memref<1x16xf32, #tpu.memory_space<vmem>>) attributes {dimension_semantics = [#tpu.dimension_semantics<parallel>, #tpu.dimension_semantics<parallel>, #tpu.dimension_semantics<arbitrary>], iteration_bounds = array<i64: 2, 4, 1>, scalar_prefetch = 0 : i64, scratch_operands = 2 : i64, tpu.core_type = #tpu.core_type<tc>, window_params = [{transform_indices = @transform_0, window_bounds = array<i64: 1, 1, 16, 32>}, {transform_indices = @transform_1, window_bounds = array<i64: 1, 1, 16, 32>}, {pipeline_mode = #tpu.pipeline_mode<synchronous>, transform_indices = @transform_2, window_bounds = array<i64: 15, 16>}, {transform_indices = @transform_3, window_bounds = array<i64: 1, 1, 1, 16>}]} {
    %c0_i32 = arith.constant 0 : i32
    %0 = arith.cmpi eq, %arg2, %c0_i32 : i32
    %1 = arith.extui %0 : i1 to i32
    %c0_i32_0 = arith.constant 0 : i32
    %2 = arith.cmpi ne, %1, %c0_i32_0 : i32
    scf.if %2 {
      %cst_39 = arith.constant 0xFF800000 : f32
      %136 = vector.broadcast %cst_39 : f32 to vector<1x16xf32>
      %c0_40 = arith.constant 0 : index
      %c0_41 = arith.constant 0 : index
      %137 = vector.load %arg7[%c0_40, %c0_41] : memref<1x16xf32, #tpu.memory_space<vmem>>, vector<1x16xf32>
      tpu.vector_store %arg7[%c0_40, %c0_41], %136 {strides = array<i32>} : memref<1x16xf32, #tpu.memory_space<vmem>>, vector<1x16xf32>,
      %cst_42 = arith.constant 0.000000e+00 : f32
      %138 = vector.broadcast %cst_42 : f32 to vector<1x16xf32>
      %c0_43 = arith.constant 0 : index
      %c0_44 = arith.constant 0 : index
      %139 = vector.load %arg8[%c0_43, %c0_44] : memref<1x16xf32, #tpu.memory_space<vmem>>, vector<1x16xf32>
      tpu.vector_store %arg8[%c0_43, %c0_44], %138 {strides = array<i32>} : memref<1x16xf32, #tpu.memory_space<vmem>>, vector<1x16xf32>,
    } else {
    }
    %c0 = arith.constant 0 : index
    %c0_1 = arith.constant 0 : index
    %c0_2 = arith.constant 0 : index
    %c0_3 = arith.constant 0 : index
    %3 = vector.load %arg3[%c0, %c0_1, %c0_2, %c0_3] : memref<1x1x16x32xbf16, #tpu.memory_space<vmem>>, vector<1x1x16x32xbf16>
    %4 = vector.shape_cast %3 : vector<1x1x16x32xbf16> to vector<16x32xbf16>
    %c0_4 = arith.constant 0 : index
    %c0_5 = arith.constant 0 : index
    %c0_6 = arith.constant 0 : index
    %c0_7 = arith.constant 0 : index
    %5 = vector.load %arg4[%c0_4, %c0_5, %c0_6, %c0_7] : memref<1x1x16x32xbf16, #tpu.memory_space<vmem>>, vector<1x1x16x32xbf16>
    %6 = vector.shape_cast %5 : vector<1x1x16x32xbf16> to vector<16x32xbf16>
    %cst = arith.constant dense<0.000000e+00> : vector<16x16xf32>
    %7 = tpu.matmul %6, %4, %cst {dimension_numbers = #tpu.dot_dimension_numbers<[1], [1], [0], [0], [0, 0, 1, 0], [], []>} : vector<16x32xbf16>, vector<16x32xbf16>, vector<16x16xf32> -> vector<16x16xf32>
    %c16_i32 = arith.constant 16 : i32
    %8 = arith.muli %arg2, %c16_i32 : i32
    %9 = tpu.iota {dimensions = array<i32: 0>} : vector<16x16xi32>
    %10 = vector.broadcast %8 : i32 to vector<16x16xi32>
    %11 = arith.addi %10, %9 : vector<16x16xi32>
    %cst_8 = arith.constant 0.000000e+00 : f32
    %12 = vector.broadcast %cst_8 : f32 to vector<16x16xf32>
    %c0_i32_9 = arith.constant 0 : i32
    %13 = arith.index_cast %c0_i32_9 : i32 to index
    %c0_10 = arith.constant 0 : index
    %14 = vector.load %arg5[%13, %c0_10] : memref<15x16xi32, #tpu.memory_space<vmem>>, vector<1x16xi32>
    %15 = vector.broadcast %14 : vector<1x16xi32> to vector<16x16xi32>
    %16 = arith.cmpi eq, %11, %15 : vector<16x16xi32>
    %17 = arith.extui %16 : vector<16x16xi1> to vector<16x16xi32>
    %18 = arith.sitofp %17 : vector<16x16xi32> to vector<16x16xf32>
    %19 = arith.addf %12, %18 : vector<16x16xf32>
    %c1_i32 = arith.constant 1 : i32
    %20 = arith.index_cast %c1_i32 : i32 to index
    %c0_11 = arith.constant 0 : index
    %21 = vector.load %arg5[%20, %c0_11] : memref<15x16xi32, #tpu.memory_space<vmem>>, vector<1x16xi32>
    %22 = vector.broadcast %21 : vector<1x16xi32> to vector<16x16xi32>
    %23 = arith.cmpi eq, %11, %22 : vector<16x16xi32>
    %24 = arith.extui %23 : vector<16x16xi1> to vector<16x16xi32>
    %25 = arith.sitofp %24 : vector<16x16xi32> to vector<16x16xf32>
    %26 = arith.addf %19, %25 : vector<16x16xf32>
    %c2_i32 = arith.constant 2 : i32
    %27 = arith.index_cast %c2_i32 : i32 to index
    %c0_12 = arith.constant 0 : index
    %28 = vector.load %arg5[%27, %c0_12] : memref<15x16xi32, #tpu.memory_space<vmem>>, vector<1x16xi32>
    %29 = vector.broadcast %28 : vector<1x16xi32> to vector<16x16xi32>
    %30 = arith.cmpi eq, %11, %29 : vector<16x16xi32>
    %31 = arith.extui %30 : vector<16x16xi1> to vector<16x16xi32>
    %32 = arith.sitofp %31 : vector<16x16xi32> to vector<16x16xf32>
    %33 = arith.addf %26, %32 : vector<16x16xf32>
    %c3_i32 = arith.constant 3 : i32
    %34 = arith.index_cast %c3_i32 : i32 to index
    %c0_13 = arith.constant 0 : index
    %35 = vector.load %arg5[%34, %c0_13] : memref<15x16xi32, #tpu.memory_space<vmem>>, vector<1x16xi32>
    %36 = vector.broadcast %35 : vector<1x16xi32> to vector<16x16xi32>
    %37 = arith.cmpi eq, %11, %36 : vector<16x16xi32>
    %38 = arith.extui %37 : vector<16x16xi1> to vector<16x16xi32>
    %39 = arith.sitofp %38 : vector<16x16xi32> to vector<16x16xf32>
    %40 = arith.addf %33, %39 : vector<16x16xf32>
    %c4_i32 = arith.constant 4 : i32
    %41 = arith.index_cast %c4_i32 : i32 to index
    %c0_14 = arith.constant 0 : index
    %42 = vector.load %arg5[%41, %c0_14] : memref<15x16xi32, #tpu.memory_space<vmem>>, vector<1x16xi32>
    %43 = vector.broadcast %42 : vector<1x16xi32> to vector<16x16xi32>
    %44 = arith.cmpi eq, %11, %43 : vector<16x16xi32>
    %45 = arith.extui %44 : vector<16x16xi1> to vector<16x16xi32>
    %46 = arith.sitofp %45 : vector<16x16xi32> to vector<16x16xf32>
    %47 = arith.addf %40, %46 : vector<16x16xf32>
    %c5_i32 = arith.constant 5 : i32
    %48 = arith.index_cast %c5_i32 : i32 to index
    %c0_15 = arith.constant 0 : index
    %49 = vector.load %arg5[%48, %c0_15] : memref<15x16xi32, #tpu.memory_space<vmem>>, vector<1x16xi32>
    %50 = vector.broadcast %49 : vector<1x16xi32> to vector<16x16xi32>
    %51 = arith.cmpi eq, %11, %50 : vector<16x16xi32>
    %52 = arith.extui %51 : vector<16x16xi1> to vector<16x16xi32>
    %53 = arith.sitofp %52 : vector<16x16xi32> to vector<16x16xf32>
    %54 = arith.addf %47, %53 : vector<16x16xf32>
    %c6_i32 = arith.constant 6 : i32
    %55 = arith.index_cast %c6_i32 : i32 to index
    %c0_16 = arith.constant 0 : index
    %56 = vector.load %arg5[%55, %c0_16] : memref<15x16xi32, #tpu.memory_space<vmem>>, vector<1x16xi32>
    %57 = vector.broadcast %56 : vector<1x16xi32> to vector<16x16xi32>
    %58 = arith.cmpi eq, %11, %57 : vector<16x16xi32>
    %59 = arith.extui %58 : vector<16x16xi1> to vector<16x16xi32>
    %60 = arith.sitofp %59 : vector<16x16xi32> to vector<16x16xf32>
    %61 = arith.addf %54, %60 : vector<16x16xf32>
    %c7_i32 = arith.constant 7 : i32
    %62 = arith.index_cast %c7_i32 : i32 to index
    %c0_17 = arith.constant 0 : index
    %63 = vector.load %arg5[%62, %c0_17] : memref<15x16xi32, #tpu.memory_space<vmem>>, vector<1x16xi32>
    %64 = vector.broadcast %63 : vector<1x16xi32> to vector<16x16xi32>
    %65 = arith.cmpi eq, %11, %64 : vector<16x16xi32>
    %66 = arith.extui %65 : vector<16x16xi1> to vector<16x16xi32>
    %67 = arith.sitofp %66 : vector<16x16xi32> to vector<16x16xf32>
    %68 = arith.addf %61, %67 : vector<16x16xf32>
    %c8_i32 = arith.constant 8 : i32
    %69 = arith.index_cast %c8_i32 : i32 to index
    %c0_18 = arith.constant 0 : index
    %70 = vector.load %arg5[%69, %c0_18] : memref<15x16xi32, #tpu.memory_space<vmem>>, vector<1x16xi32>
    %71 = vector.broadcast %70 : vector<1x16xi32> to vector<16x16xi32>
    %72 = arith.cmpi eq, %11, %71 : vector<16x16xi32>
    %73 = arith.extui %72 : vector<16x16xi1> to vector<16x16xi32>
    %74 = arith.sitofp %73 : vector<16x16xi32> to vector<16x16xf32>
    %75 = arith.addf %68, %74 : vector<16x16xf32>
    %c9_i32 = arith.constant 9 : i32
    %76 = arith.index_cast %c9_i32 : i32 to index
    %c0_19 = arith.constant 0 : index
    %77 = vector.load %arg5[%76, %c0_19] : memref<15x16xi32, #tpu.memory_space<vmem>>, vector<1x16xi32>
    %78 = vector.broadcast %77 : vector<1x16xi32> to vector<16x16xi32>
    %79 = arith.cmpi eq, %11, %78 : vector<16x16xi32>
    %80 = arith.extui %79 : vector<16x16xi1> to vector<16x16xi32>
    %81 = arith.sitofp %80 : vector<16x16xi32> to vector<16x16xf32>
    %82 = arith.addf %75, %81 : vector<16x16xf32>
    %c10_i32 = arith.constant 10 : i32
    %83 = arith.index_cast %c10_i32 : i32 to index
    %c0_20 = arith.constant 0 : index
    %84 = vector.load %arg5[%83, %c0_20] : memref<15x16xi32, #tpu.memory_space<vmem>>, vector<1x16xi32>
    %85 = vector.broadcast %84 : vector<1x16xi32> to vector<16x16xi32>
    %86 = arith.cmpi eq, %11, %85 : vector<16x16xi32>
    %87 = arith.extui %86 : vector<16x16xi1> to vector<16x16xi32>
    %88 = arith.sitofp %87 : vector<16x16xi32> to vector<16x16xf32>
    %89 = arith.addf %82, %88 : vector<16x16xf32>
    %c11_i32 = arith.constant 11 : i32
    %90 = arith.index_cast %c11_i32 : i32 to index
    %c0_21 = arith.constant 0 : index
    %91 = vector.load %arg5[%90, %c0_21] : memref<15x16xi32, #tpu.memory_space<vmem>>, vector<1x16xi32>
    %92 = vector.broadcast %91 : vector<1x16xi32> to vector<16x16xi32>
    %93 = arith.cmpi eq, %11, %92 : vector<16x16xi32>
    %94 = arith.extui %93 : vector<16x16xi1> to vector<16x16xi32>
    %95 = arith.sitofp %94 : vector<16x16xi32> to vector<16x16xf32>
    %96 = arith.addf %89, %95 : vector<16x16xf32>
    %c12_i32 = arith.constant 12 : i32
    %97 = arith.index_cast %c12_i32 : i32 to index
    %c0_22 = arith.constant 0 : index
    %98 = vector.load %arg5[%97, %c0_22] : memref<15x16xi32, #tpu.memory_space<vmem>>, vector<1x16xi32>
    %99 = vector.broadcast %98 : vector<1x16xi32> to vector<16x16xi32>
    %100 = arith.cmpi eq, %11, %99 : vector<16x16xi32>
    %101 = arith.extui %100 : vector<16x16xi1> to vector<16x16xi32>
    %102 = arith.sitofp %101 : vector<16x16xi32> to vector<16x16xf32>
    %103 = arith.addf %96, %102 : vector<16x16xf32>
    %c13_i32 = arith.constant 13 : i32
    %104 = arith.index_cast %c13_i32 : i32 to index
    %c0_23 = arith.constant 0 : index
    %105 = vector.load %arg5[%104, %c0_23] : memref<15x16xi32, #tpu.memory_space<vmem>>, vector<1x16xi32>
    %106 = vector.broadcast %105 : vector<1x16xi32> to vector<16x16xi32>
    %107 = arith.cmpi eq, %11, %106 : vector<16x16xi32>
    %108 = arith.extui %107 : vector<16x16xi1> to vector<16x16xi32>
    %109 = arith.sitofp %108 : vector<16x16xi32> to vector<16x16xf32>
    %110 = arith.addf %103, %109 : vector<16x16xf32>
    %c14_i32 = arith.constant 14 : i32
    %111 = arith.index_cast %c14_i32 : i32 to index
    %c0_24 = arith.constant 0 : index
    %112 = vector.load %arg5[%111, %c0_24] : memref<15x16xi32, #tpu.memory_space<vmem>>, vector<1x16xi32>
    %113 = vector.broadcast %112 : vector<1x16xi32> to vector<16x16xi32>
    %114 = arith.cmpi eq, %11, %113 : vector<16x16xi32>
    %115 = arith.extui %114 : vector<16x16xi1> to vector<16x16xi32>
    %116 = arith.sitofp %115 : vector<16x16xi32> to vector<16x16xf32>
    %117 = arith.addf %110, %116 : vector<16x16xf32>
    %c15_i32 = arith.constant 15 : i32
    %c0_25 = arith.constant 0 : index
    %c0_26 = arith.constant 0 : index
    %118 = vector.load %arg8[%c0_25, %c0_26] : memref<1x16xf32, #tpu.memory_space<vmem>>, vector<1x16xf32>
    %119 = arith.mulf %7, %117 : vector<16x16xf32>
    %cst_27 = arith.constant dense<0.000000e+00> : vector<16xf32>
    %120 = vector.multi_reduction <add>, %119, %cst_27 [0] : vector<16x16xf32> to vector<16xf32>
    %121 = vector.shape_cast %120 : vector<16xf32> to vector<1x16xf32>
    %122 = arith.addf %118, %121 : vector<1x16xf32>
    %c0_28 = arith.constant 0 : index
    %c0_29 = arith.constant 0 : index
    %123 = vector.load %arg8[%c0_28, %c0_29] : memref<1x16xf32, #tpu.memory_space<vmem>>, vector<1x16xf32>
    tpu.vector_store %arg8[%c0_28, %c0_29], %122 {strides = array<i32>} : memref<1x16xf32, #tpu.memory_space<vmem>>, vector<1x16xf32>,
    %c0_30 = arith.constant 0 : index
    %c0_31 = arith.constant 0 : index
    %124 = vector.load %arg7[%c0_30, %c0_31] : memref<1x16xf32, #tpu.memory_space<vmem>>, vector<1x16xf32>
    %cst_32 = arith.constant 0.000000e+00 : f32
    %125 = vector.broadcast %cst_32 : f32 to vector<16x16xf32>
    %126 = arith.cmpf ogt, %117, %125 : vector<16x16xf32>
    %cst_33 = arith.constant 0xFF800000 : f32
    %127 = vector.broadcast %cst_33 : f32 to vector<16x16xf32>
    %128 = arith.select %126, %7, %127 : vector<16x16xi1>, vector<16x16xf32>
    %cst_34 = arith.constant dense<0xFF800000> : vector<16xf32>
    %129 = vector.multi_reduction <maximumf>, %128, %cst_34 [0] : vector<16x16xf32> to vector<16xf32>
    %130 = vector.shape_cast %129 : vector<16xf32> to vector<1x16xf32>
    %131 = arith.maximumf %124, %130 : vector<1x16xf32>
    %c0_35 = arith.constant 0 : index
    %c0_36 = arith.constant 0 : index
    %132 = vector.load %arg7[%c0_35, %c0_36] : memref<1x16xf32, #tpu.memory_space<vmem>>, vector<1x16xf32>
    tpu.vector_store %arg7[%c0_35, %c0_36], %131 {strides = array<i32>} : memref<1x16xf32, #tpu.memory_space<vmem>>, vector<1x16xf32>,
    %c0_i32_37 = arith.constant 0 : i32
    %133 = arith.cmpi eq, %arg2, %c0_i32_37 : i32
    %134 = arith.extui %133 : i1 to i32
    %c0_i32_38 = arith.constant 0 : i32
    %135 = arith.cmpi ne, %134, %c0_i32_38 : i32
    scf.if %135 {
      %c0_39 = arith.constant 0 : index
      %c0_40 = arith.constant 0 : index
      %136 = vector.load %arg7[%c0_39, %c0_40] : memref<1x16xf32, #tpu.memory_space<vmem>>, vector<1x16xf32>
      %c0_41 = arith.constant 0 : index
      %c0_42 = arith.constant 0 : index
      %137 = vector.load %arg8[%c0_41, %c0_42] : memref<1x16xf32, #tpu.memory_space<vmem>>, vector<1x16xf32>
      %cst_43 = arith.constant 0.0666666701 : f32
      %138 = vector.broadcast %cst_43 : f32 to vector<1x16xf32>
      %139 = arith.mulf %137, %138 : vector<1x16xf32>
      %140 = arith.subf %136, %139 : vector<1x16xf32>
      %c0_44 = arith.constant 0 : index
      %c0_45 = arith.constant 0 : index
      %c0_46 = arith.constant 0 : index
      %c0_47 = arith.constant 0 : index
      %141 = vector.load %arg6[%c0_44, %c0_45, %c0_46, %c0_47] : memref<1x1x1x16xf32, #tpu.memory_space<vmem>>, vector<1x1x1x16xf32>
      %142 = vector.shape_cast %141 : vector<1x1x1x16xf32> to vector<1x16xf32>
      %143 = vector.shape_cast %140 : vector<1x16xf32> to vector<1x1x1x16xf32>
      tpu.vector_store %arg6[%c0_44, %c0_45, %c0_46, %c0_47], %143 {strides = array<i32>} : memref<1x1x1x16xf32, #tpu.memory_space<vmem>>, vector<1x1x1x16xf32>,
    } else {
    }
    return
  }
  func.func @transform_0(%arg0: i32, %arg1: i32, %arg2: i32) -> (i32, i32, i32, i32) {
    %c0_i32 = arith.constant 0 : i32
    %c0_i32_0 = arith.constant 0 : i32
    %c0_i32_1 = arith.constant 0 : i32
    return %arg0, %arg1, %c0_i32, %c0_i32_0 : i32, i32, i32, i32
  }
  func.func @transform_1(%arg0: i32, %arg1: i32, %arg2: i32) -> (i32, i32, i32, i32) {
    %c0_i32 = arith.constant 0 : i32
    %c0_i32_0 = arith.constant 0 : i32
    return %arg0, %arg1, %arg2, %c0_i32 : i32, i32, i32, i32
  }
  func.func @transform_2(%arg0: i32, %arg1: i32, %arg2: i32) -> (i32, i32) {
    %c0_i32 = arith.constant 0 : i32
    %c0_i32_0 = arith.constant 0 : i32
    %c0_i32_1 = arith.constant 0 : i32
    return %c0_i32, %c0_i32_0 : i32, i32
  }
  func.func @transform_3(%arg0: i32, %arg1: i32, %arg2: i32) -> (i32, i32, i32, i32) {
    %c0_i32 = arith.constant 0 : i32
    %c0_i32_0 = arith.constant 0 : i32
    %c0_i32_1 = arith.constant 0 : i32
    return %arg0, %arg1, %c0_i32, %c0_i32_0 : i32, i32, i32, i32
  }
}

</mosaic_0001>

<bundles_post_ra>
// kernel: tpu_custom_call.1
= control target key start
LH: loop header
LB: loop body
LE: loop exit
PB: predicated region body
PF: predicated region fallthrough
CT: control target
= control target key end

     0   :  { %s1398_s0 = inlined_call_operand.hbm [shape: bf16[2,4,16,32], index: 0, kind: input, shape index: {}]   ;;  %s1399_s1 = inlined_call_operand.hbm [shape: bf16[2,4,16,32], index: 1, kind: input, shape index: {}]   ;;  %s1400_s2 = inlined_call_operand.hbm [shape: s32[15,16], index: 2, kind: input, shape index: {}]   ;;  %s1401_s3 = inlined_call_operand.hbm [shape: f32[2,4,1,16], index: 3, kind: output, shape index: {}]  }
   0x1   :  { %1407 = sst [smem:[#allocation21_spill]] %s1398_s0 }
   0x2   :  { %1408 = sst [smem:[#allocation22_spill]] %s1400_s2 }
   0x3   :  { %8 = vsyncpa [#allocation5], 0 }
   0x4   :  { %10 = vsyncpa [#allocation5 + $0x1], 0 }
   0x5   :  { %11 = vsyncpa [#allocation8], 0 }
   0x6   :  { %13 = vsyncpa [#allocation8 + $0x1], 0 }
   0x7   :  { %14 = vsyncpa [#allocation6], 0 }
   0x8   :  { %16 = vsyncpa [#allocation6 + $0x1], 0  ;;  %s1124_s12 = smov 0   ;;  %s1126_s13 = smov 0  }
   0x9   :  { %s1128_s14 = smov 0   ;;  %s1130_s15 = smov 0  }
   0xa   :  { %s1132_s16 = smov 0   ;;  %s1134_s17 = smov 0  }
   0xb   :  { %s1136_s18 = smov 0   ;;  %s1138_s19 = smov 0  }
   0xc LB: > { %1409 = sst [smem:[#allocation15_spill]] %s1083_s17  ;;  %s1165_s20 = sadd.s32 4294967295, %s1091_s19   ;;  %s1091_s19 = sphi %s1138_s19, %s22_s19   ;;  %s1087_s18 = sphi %s1136_s18, %s1430_s18   ;;  %s1083_s17 = sphi %s1134_s17, %s1434_s17   ;;  %s1079_s16 = sphi %s1132_s16, %s1428_s16   ;;  %s1075_s15 = sphi %s1130_s15, %s1427_s15   ;;  %s1071_s14 = sphi %s1128_s14, %s1433_s14   ;;  %s1067_s13 = sphi %s1126_s13, %s1432_s13   ;;  %s1063_s12 = sphi %s1124_s12, %s1431_s12  }
   0xd   : > { %1410 = sst [smem:[#allocation16_spill]] %s1087_s18  ;;  %s726_s21 = sadd.s32 4294967294, %s1091_s19  }
   0xe   : > { %p63_p0 = scmp.ne.s32.totalorder %s1067_s13, %s1063_s12  ;;  %p64_p1 = scmp.eq.s32.totalorder %s1165_s20, 0 }
   0xf   : > { %p146_p3 = scmp.eq.s32.totalorder %s726_s21, 7  ;;  %p727_p5 = scmp.ge.s32.totalorder %s1091_s19, 1 }
  0x10   : > { %p1174_p4 = por %p64_p1, %p63_p0  ;;  %p153_p7 = scmp.lt.s32.totalorder %s1091_s19, 9 }
  0x11   : > { %p1179_p6 = por %p146_p3, %p63_p0  ;;  %s1093_s25 = smov [#allocation9]  }
  0x12   : > { %p1184_p8 = pnand %p727_p5, %p153_p7  ;;  %s165_s26 = sshll.u32 %s1093_s25, 4  ;;  %s166_s26 = int_to_ptr.vmem [resolvable:$true] %s165_s26 }
  0x13   : > { %s1412_s23 = scalar_select %p1179_p6, 1, 0 }
  0x14   : > { %p812_p9 = pneg %p1184_p8  ;;  %s916_s27 = scalar_lea.vmem %s166_s26, 256 }
  0x15   : > { %1413 = sst [smem:[#allocation17_spill]] %s1412_s23  ;;  %p917_p12 = scmp.ne.s32.totalorder %s166_s26, %s916_s27 }
  0x16   : > { %p813_p10 = pnand %p812_p9, %p64_p1  ;;  %p924_p3 = scmp.lt.s32.totalorder %s166_s26, %s166_s26 }
  0x17   : > { %p925_p2 = scmp.lt.s32.totalorder %s916_s27, %s916_s27 }
  0x18   : > { %p907_p11 = pneg %p813_p10 }
  0x19   : > { %p926_p6 = por %p925_p2, %p924_p3 }
  0x1a   : > { %p919_p13 = pnand %p917_p12, %p907_p11 }
  0x1c   : > { %p920_p0 = pneg %p919_p13 }
  0x1e   : > { %p927_p5 = pnand %p926_p6, %p920_p0 }
  0x20   : > { %930 = shalt.err (!%p927_p5)
}
  0x21   : > { %s1094_s28 = smov 128   ;;  %s1095_s29 = smov 8  }
  0x22   : > { %s1415_s2 = sld [smem:[#allocation22_spill]]  ;;  %s37_s5 = sadd.s32 1, %s1083_s17 }
  0x23   : > { %p39_p2 = scmp.ge.s32.totalorder %s37_s5, 4  ;;  %s41_s6 = sadd.s32 1, %s1087_s18 }
  0x24   : > { %s50_s7 = sadd.s32 1, %s1071_s14  ;;  %p57_p6 = scmp.ne.s32.totalorder %s1071_s14, %s1067_s13 }
  0x25   : > { %s1436_s5 = smov (%p39_p2, %s37_s5), 0  ;;  %s1438_s6 = smov (!%p39_p2, %s41_s6), %s1087_s18 }
  0x26   : > { %1416 = sst [smem:[#allocation18_spill]] %s1436_s5  ;;  %s46_s8 = ssub.s32 %s1083_s17, %s1436_s5 }
  0x27   : > { %p58_p7 = scmp.eq.s32.totalorder %s1091_s19, 0  ;;  %p43_p9 = scmp.ge.s32.totalorder %s1438_s6, 2 }
  0x28   : > { %815 = dma.hbm_to_vmem [thread:$0]  (!%p813_p10), %s1415_s2, 256, %s166_s26, [#allocation8], %s1094_s28, %s1094_s28, %s1095_s29  }
  0x29   : > { %p1417_p11 = scmp.eq.s32.totalorder %s1165_s20, 7  ;;  %p1212_p10 = por %p58_p7, %p57_p6 }
  0x2a   : > { %p828_p13 = scmp.lt.s32.totalorder %s1091_s19, 8  ;;  %s1440_s6 = smov (%p43_p9, %s1438_s6), 0 }
  0x2b   : > { %p1208_p12 = por %p1417_p11, %p57_p6  ;;  %1420 = sst [smem:[#allocation19_spill]] %s1440_s6 }
  0x2c   : > { %s179_s11 = sand.u32 1, %s1071_s14   ;;  %s731_s21 = sshll.u32 %s1083_s17, 1 }
  0x2d   : > { %s45_s25 = ssub.s32 %s1087_s18, %s1440_s6  ;;  %s1223_s27 = sshll.u32 %s179_s11, 3 }
  0x2e   : > { %s47_s26 = sor.u32 %s46_s8, %s45_s25  ;;  %s732_s28 = sshll.u32 %s1087_s18, 3 }
  0x2f   : > { %p48_p0 = scmp.eq.s32.totalorder %s47_s26, 0  ;;  %s183_s29 = scalar_lea.vmem [#allocation4], %s1223_s27 }
  0x30   : > { %s192_s30 = sshll.u32 %s183_s29, 4  ;;  %s189_s2 = sadd.s32 %s732_s28, %s731_s21  ;;  %s193_s30 = int_to_ptr.vmem [resolvable:$true] %s192_s30 }
  0x31   : > { %s1228_s4 = scalar_select %p48_p0, %s1071_s14, %s50_s7  }
  0x32   : > { %s733_s5 = sshll.u32 %s189_s2, 6  ;;  %p1234_p3 = pnand %p828_p13, %p1212_p10 }
  0x33   : > { %1421 = sst [smem:[#allocation20_spill]] %s1228_s4  ;;  %s180_s26 = scalar_lea.sflag [#allocation5], %s179_s11 }
  0x34   : > { %s1423_s0 = sld [smem:[#allocation21_spill]]  ;;  %p933_p5 = pneg %p1234_p3 }
  0x35   : > { %s944_s7 = scalar_lea.vmem %s193_s30, 128  ;;  %s1096_s2 = smov [#allocation4]  }
  0x36   : > { %p945_p2 = scmp.ne.s32.totalorder %s193_s30, %s944_s7  ;;  %s949_s10 = sshll.u32 %s1096_s2, 4  ;;  %s950_s10 = int_to_ptr.vmem [resolvable:$false] %s949_s10 }
  0x37   : > { %s951_s21 = scalar_lea.vmem %s950_s10, 256  ;;  %p952_p9 = scmp.lt.s32.totalorder %s193_s30, %s950_s10 }
  0x38   : > { %p947_p6 = pnand %p945_p2, %p933_p5  ;;  %p953_p11 = scmp.lt.s32.totalorder %s951_s21, %s944_s7 }
  0x3a   : > { %s191_s25 = scalar_lea.hbm %s1423_s0, %s733_s5  ;;  %p948_p7 = pneg %p947_p6 }
  0x3b   : > { %p954_p10 = por %p953_p11, %p952_p9 }
  0x3d   : > { %p955_p13 = pnand %p954_p10, %p948_p7 }
  0x3f   : > { %958 = shalt.err (!%p955_p13)
}
  0x40   : > { %s1097_s6 = smov 64   ;;  %s1098_s11 = smov 4  }
  0x41   : > { %819 = dma.hbm_to_vmem [thread:$0]  (!%p1234_p3), %s191_s25, 128, %s193_s30, %s180_s26, %s1097_s6, %s1097_s6, %s1098_s11  }
  0x42   : > { %s216_s8 = scalar_lea.hbm %s1399_s1, %s733_s5  ;;  %s206_s2 = scalar_lea.vmem [#allocation7], %s1223_s27 }
  0x43   : > { %s217_s0 = sshll.u32 %s206_s2, 4  ;;  %s202_s18 = sand.u32 1, %s1091_s19   ;;  %s218_s0 = int_to_ptr.vmem [resolvable:$true] %s217_s0 }
  0x44   : > { %s203_s7 = scalar_lea.sflag [#allocation8], %s202_s18  ;;  %s972_s10 = scalar_lea.vmem %s218_s0, 128 }
  0x45   : > { %p973_p0 = scmp.ne.s32.totalorder %s218_s0, %s972_s10  ;;  %s1099_s21 = smov [#allocation7]  }
  0x46   : > { %s977_s17 = sshll.u32 %s1099_s21, 4  ;;  %s978_s17 = int_to_ptr.vmem [resolvable:$false] %s977_s17 }
  0x47   : > { %p975_p2 = pnand %p973_p0, %p933_p5  ;;  %s979_s4 = scalar_lea.vmem %s978_s17, 256 }
  0x48   : > { %p980_p7 = scmp.lt.s32.totalorder %s218_s0, %s978_s17  ;;  %p981_p9 = scmp.lt.s32.totalorder %s979_s4, %s972_s10 }
  0x49   : > { %p976_p6 = pneg %p975_p2 }
  0x4a   : > { %p982_p11 = por %p981_p9, %p980_p7 }
  0x4c   : > { %p983_p10 = pnand %p982_p11, %p976_p6 }
  0x4e   : > { %986 = shalt.err (!%p983_p10)
}
  0x4f   : > { %822 = dma.hbm_to_vmem [thread:$0]  (!%p1234_p3), %s216_s8, 128, %s218_s0, %s203_s7, %s1097_s6, %s1097_s6, %s1098_s11  }
  0x50   : > { %229 = sbr.rel (%p1184_p8) target bundleno = 341 (0x155), region = 32  ;;  %s1261_s18 = sand.u32 (!%p1184_p8), 1, %s1067_s13  }
  0x51   : > { %s739_s5 = sshll.u32 (!%p1184_p8), %s1261_s18, 3  ;;  %s232_s27 = scalar_lea.sflag (!%p1184_p8), [#allocation5], %s1261_s18 }
  0x52   : > { %s235_s30 = scalar_lea.vmem (!%p1184_p8), [#allocation4], %s739_s5 }
  0x55   : > { %1046 = dma.done.wait (%p1174_p4), %s232_s27, 128  }
  0x56   : > { %1048 = vsyncadd (%p1174_p4), %s232_s27, 4294967168  ;;  %s240_s0 = sand.u32 1, %s1165_s20   ;;  %s244_s23 = scalar_lea.vmem [#allocation7], %s739_s5 }
  0x57   : > { %s241_s17 = scalar_lea.sflag [#allocation8], %s240_s0 }
  0x58   : > { %1050 = dma.done.wait (%p1174_p4), %s241_s17, 128  }
  0x59   : > { %1052 = vsyncadd (%p1174_p4), %s241_s17, 4294967168 }
  0x5a   : > { %1054 = dma.done.wait (%p64_p1), [#allocation8], 256  }
  0x5b   : > { %1056 = vsyncadd (%p64_p1), [#allocation8], 4294967040  ;;  %v1100_v0 = vmov 0.0   ;;  %vm1101_vm0 = vmmov 0   ;;  %vm298_vm1 = vcmask 261120   ;;  %v903_v1 = vld [vmem:[%s235_s30] sm:$0xff]   ;;  %v347_v5 = vlaneseq }
  0x5c   : > { %796 = vmatprep.subr.bf16.mxu0 %v1100_v0  ;;  %798 = vmatprep.mubr.msk.bf16.mxu0 %vm1101_vm0, %v1100_v0  ;;  %v303_v2 = vsel %vm298_vm1, %v903_v1, 0  ;;  %v904_v3 = vld [vmem:[%s244_s23] sm:$0xff]   ;;  %vm281_vm2 = vcmask 122880   ;;  %v1102_v4 = vmov -inf   ;;  %v745_v7 = vld [vmem:[#allocation9] ss:$0 sm:$0xff] }
  0x5d   : > { %797 = vmatpush3.bf16.xpose.msra.mxu0 %v303_v2  ;;  %282 = vst.msk [vmem:[#allocation2] sm:$0x1] %vm281_vm2, %v1102_v4  ;;  %283 = vst.msk [vmem:[#allocation3] sm:$0x1] %vm281_vm2, %v1100_v0  ;;  %v1283_v6 = vshrl.u32 %v347_v5, 7  ;;  %s790_s20 = sshll.u32 %s1079_s16, 2 }
  0x5e   : > { %v748_v8 = vld [vmem:[#allocation9 + $0x1] ss:$0 sm:$0xff]  ;;  %v751_v10 = vld [vmem:[#allocation9 + $0x2] ss:$0 sm:$0xff]  ;;  %v754_v13 = vld [vmem:[#allocation9 + $0x3] ss:$0 sm:$0xff]  ;;  %s599_s22 = sadd.s32 %s1075_s15, %s790_s20 }
  0x5f   : > { %v1286_v9 = vadd.s32 8, %v1283_v6  ;;  %vm358_vm3 = vcmp.eq.s32.totalorder %v1283_v6, %v745_v7  ;;  %vm371_vm4 = vcmp.eq.s32.totalorder %v1283_v6, %v748_v8  ;;  %vm384_vm7 = vcmp.eq.s32.totalorder %v1283_v6, %v751_v10  ;;  %v757_v19 = vld [vmem:[#allocation9 + $0x4] ss:$0 sm:$0xff]  ;;  %v760_v24 = vld [vmem:[#allocation9 + $0x5] ss:$0 sm:$0xff]  ;;  %s791_s24 = sshll.u32 %s599_s22, 4 }
  0x60   : > { %v746_v11 = vsel %vm358_vm3, 1.0, %v1100_v0  ;;  %v749_v12 = vsel %vm371_vm4, 1.0, %v1100_v0  ;;  %v752_v17 = vsel %vm384_vm7, 1.0, %v1100_v0  ;;  %vm397_vm9 = vcmp.eq.s32.totalorder %v1283_v6, %v754_v13  ;;  %v763_v29 = vld [vmem:[#allocation9 + $0x6] ss:$0 sm:$0xff]  ;;  %s274_s4 = scalar_lea.vmem [#allocation10], %s1261_s18  ;;  %s601_s11 = scalar_lea.hbm %s1401_s3, %s791_s24 }
  0x61   : > { %vm359_vm5 = vcmp.eq.s32.totalorder %v1286_v9, %v745_v7  ;;  %vm372_vm6 = vcmp.eq.s32.totalorder %v1286_v9, %v748_v8  ;;  %v377_v16 = vadd.f32 %v749_v12, %v746_v11  ;;  %vm385_vm8 = vcmp.eq.s32.totalorder %v1286_v9, %v751_v10  ;;  %v766_v34 = vld [vmem:[#allocation9 + $0x7] ss:$0 sm:$0xff]  ;;  %v769_v39 = vld [vmem:[#allocation9 + $0x8] ss:$0 sm:$0xff]  ;;  %v772_v44 = vld [vmem:[#allocation9 + $0x9] ss:$0 sm:$0xff] }
  0x62   : > { %v747_v14 = vsel %vm359_vm5, 1.0, %v1100_v0  ;;  %v750_v15 = vsel %vm372_vm6, 1.0, %v1100_v0  ;;  %v753_v20 = vsel %vm385_vm8, 1.0, %v1100_v0  ;;  %vm398_vm10 = vcmp.eq.s32.totalorder %v1286_v9, %v754_v13  ;;  %v775_v49 = vld [vmem:[#allocation9 + $0xa] ss:$0 sm:$0xff]  ;;  %s603_s25 = sshll.u32 %s274_s4, 4  ;;  %s604_s25 = int_to_ptr.vmem [resolvable:$true] %s603_s25 }
  0x63   : > { %v378_v18 = vadd.f32 %v750_v15, %v747_v14  ;;  %v390_v21 = vadd.f32 %v752_v17, %v377_v16  ;;  %v755_v22 = vsel %vm397_vm9, 1.0, %v1100_v0  ;;  %vm410_vm11 = vcmp.eq.s32.totalorder %v1283_v6, %v757_v19  ;;  %v778_v54 = vld [vmem:[#allocation9 + $0xb] ss:$0 sm:$0xff]  ;;  %v781_v59 = vld [vmem:[#allocation9 + $0xc] ss:$0 sm:$0xff]  ;;  %s589_s28 = scalar_lea.sflag [#allocation6], %s1261_s18 }
  0x64   : > { %799 = vmatmul.mubr.msk.bf16.vlgmr.msra.gmra.mxu0 %vm298_vm1, %v904_v3  ;;  %v756_v25 = vsel %vm398_vm10, 1.0, %v1100_v0  ;;  %vm411_vm12 = vcmp.eq.s32.totalorder %v1286_v9, %v757_v19  ;;  %v758_v27 = vsel %vm410_vm11, 1.0, %v1100_v0  ;;  %vm423_vm13 = vcmp.eq.s32.totalorder %v1283_v6, %v760_v24  ;;  %v784_v1 = vld [vmem:[#allocation9 + $0xd] ss:$0 sm:$0xff]  ;;  %v787_v7 = vld [vmem:[#allocation9 + $0xe] ss:$0 sm:$0xff] }
  0x65   : > { %v391_v23 = vadd.f32 %v753_v20, %v378_v18  ;;  %v403_v26 = vadd.f32 %v755_v22, %v390_v21  ;;  %v759_v30 = vsel %vm411_vm12, 1.0, %v1100_v0  ;;  %vm424_vm14 = vcmp.eq.s32.totalorder %v1286_v9, %v760_v24  ;;  %s987_s29 = scalar_lea.vmem %s604_s25, 16  ;;  %s1103_s15 = smov [#allocation10]  }
  0x66   : > { %v761_v32 = vsel %vm423_vm13, 1.0, %v1100_v0  ;;  %vm436_vm15 = vcmp.eq.s32.totalorder %v1283_v6, %v763_v29  ;;  %v762_v35 = vsel %vm424_vm14, 1.0, %v1100_v0  ;;  %vm437_vm0 = vcmp.eq.s32.totalorder %v1286_v9, %v763_v29  ;;  %p988_p1 = scmp.ne.s32.totalorder %s604_s25, %s987_s29  ;;  %s991_s16 = sshll.u32 %s1103_s15, 4  ;;  %s992_s16 = int_to_ptr.vmem [resolvable:$false] %s991_s16 }
  0x67   : > { %v404_v28 = vadd.f32 %v756_v25, %v391_v23  ;;  %v416_v31 = vadd.f32 %v758_v27, %v403_v26  ;;  %v764_v37 = vsel %vm436_vm15, 1.0, %v1100_v0  ;;  %vm449_vm1 = vcmp.eq.s32.totalorder %v1283_v6, %v766_v34  ;;  %s993_s8 = scalar_lea.vmem %s992_s16, 32  ;;  %p994_p3 = scmp.lt.s32.totalorder %s604_s25, %s992_s16 }
  0x68   : > { %v765_v40 = vsel %vm437_vm0, 1.0, %v1100_v0  ;;  %vm450_vm3 = vcmp.eq.s32.totalorder %v1286_v9, %v766_v34  ;;  %v767_v42 = vsel %vm449_vm1, 1.0, %v1100_v0  ;;  %vm462_vm4 = vcmp.eq.s32.totalorder %v1283_v6, %v769_v39  ;;  %p989_p4 = pnand %p988_p1, %p1208_p12  ;;  %p995_p5 = scmp.lt.s32.totalorder %s993_s8, %s987_s29 }
  0x69   : > { %v417_v33 = vadd.f32 %v759_v30, %v404_v28  ;;  %v429_v36 = vadd.f32 %v761_v32, %v416_v31  ;;  %v768_v45 = vsel %vm450_vm3, 1.0, %v1100_v0  ;;  %vm463_vm5 = vcmp.eq.s32.totalorder %v1286_v9, %v769_v39 }
  0x6a   : > { %v770_v47 = vsel %vm462_vm4, 1.0, %v1100_v0  ;;  %vm475_vm6 = vcmp.eq.s32.totalorder %v1283_v6, %v772_v44  ;;  %v771_v50 = vsel %vm463_vm5, 1.0, %v1100_v0  ;;  %vm476_vm7 = vcmp.eq.s32.totalorder %v1286_v9, %v772_v44  ;;  %p990_p8 = pneg %p989_p4  ;;  %p996_p13 = por %p995_p5, %p994_p3 }
  0x6b   : > { %v430_v38 = vadd.f32 %v762_v35, %v417_v33  ;;  %v442_v41 = vadd.f32 %v764_v37, %v429_v36  ;;  %v773_v52 = vsel %vm475_vm6, 1.0, %v1100_v0  ;;  %vm488_vm8 = vcmp.eq.s32.totalorder %v1283_v6, %v775_v49 }
  0x6c   : > { %v774_v55 = vsel %vm476_vm7, 1.0, %v1100_v0  ;;  %vm489_vm9 = vcmp.eq.s32.totalorder %v1286_v9, %v775_v49  ;;  %v776_v57 = vsel %vm488_vm8, 1.0, %v1100_v0  ;;  %vm501_vm10 = vcmp.eq.s32.totalorder %v1283_v6, %v778_v54  ;;  %p997_p0 = pnand %p996_p13, %p990_p8 }
  0x6d   : > { %v443_v43 = vadd.f32 %v765_v40, %v430_v38  ;;  %v455_v46 = vadd.f32 %v767_v42, %v442_v41  ;;  %v777_v60 = vsel %vm489_vm9, 1.0, %v1100_v0  ;;  %vm502_vm11 = vcmp.eq.s32.totalorder %v1286_v9, %v778_v54  ;;  %v564_v41 = vld [vmem:[#allocation2] sm:$0x1]  ;;  %v548_v42 = vld [vmem:[#allocation3] sm:$0x1] }
  0x6e   : > { %v779_v62 = vsel %vm501_vm10, 1.0, %v1100_v0  ;;  %vm514_vm12 = vcmp.eq.s32.totalorder %v1283_v6, %v781_v59  ;;  %v780_v2 = vsel %vm502_vm11, 1.0, %v1100_v0  ;;  %vm515_vm13 = vcmp.eq.s32.totalorder %v1286_v9, %v781_v59 }
  0x6f   : > { %v456_v48 = vadd.f32 %v768_v45, %v443_v43  ;;  %v468_v51 = vadd.f32 %v770_v47, %v455_v46  ;;  %v782_v4 = vsel %vm514_vm12, 1.0, %v1100_v0  ;;  %vm527_vm14 = vcmp.eq.s32.totalorder %v1283_v6, %v784_v1 }
  0x70   : > { %v783_v8 = vsel %vm515_vm13, 1.0, %v1100_v0  ;;  %vm528_vm15 = vcmp.eq.s32.totalorder %v1286_v9, %v784_v1  ;;  %v785_v11 = vsel %vm527_vm14, 1.0, %v1100_v0  ;;  %vm540_vm0 = vcmp.eq.s32.totalorder %v1283_v6, %v787_v7 }
  0x71   : > { %v469_v53 = vadd.f32 %v771_v50, %v456_v48  ;;  %v481_v56 = vadd.f32 %v773_v52, %v468_v51  ;;  %v786_v13 = vsel %vm528_vm15, 1.0, %v1100_v0  ;;  %vm541_vm1 = vcmp.eq.s32.totalorder %v1286_v9, %v787_v7 }
  0x72   : > { %v788_v15 = vsel %vm540_vm0, 1.0, %v1100_v0  ;;  %v789_v17 = vsel %vm541_vm1, 1.0, %v1100_v0  ;;  %vm551_vm5 = vcmask 130048  }
  0x73   : > { %v482_v58 = vadd.f32 %v774_v55, %v469_v53  ;;  %v494_v61 = vadd.f32 %v776_v57, %v481_v56 }
  0x75   : > { %v495_v63 = vadd.f32 %v777_v60, %v482_v58  ;;  %v507_v3 = vadd.f32 %v779_v62, %v494_v61 }
  0x77   : > { %v508_v5 = vadd.f32 %v780_v2, %v495_v63  ;;  %v520_v10 = vadd.f32 %v782_v4, %v507_v3 }
  0x79   : > { %v521_v12 = vadd.f32 %v783_v8, %v508_v5  ;;  %v533_v14 = vadd.f32 %v785_v11, %v520_v10 }
  0x7b   : > { %v534_v16 = vadd.f32 %v786_v13, %v521_v12  ;;  %v546_v18 = vadd.f32 %v788_v15, %v533_v14 }
  0x7d   : > { %v547_v19 = vadd.f32 %v789_v17, %v534_v16  ;;  %vm565_vm3 = vcmp.gt.f32.partialorder %v546_v18, 0.0 }
  0x7f   : > { %vm566_vm4 = vcmp.gt.f32.partialorder %v547_v19, 0.0 }
 0x124   : > { %v339_v20 = vpop.f32.mrf.mxu0 }
 0x125   : > { %v549_v22 = vmul.f32 %v546_v18, %v339_v20  ;;  %v567_v6 = vsel %vm565_vm3, %v339_v20, -inf }
 0x126   : > { %v800_v21 = vpop.f32.mrf.mxu0  ;;  %v569_v26 = vsel %vm551_vm5, %v567_v6, -inf }
 0x127   : > { %v552_v28 = vsel %vm551_vm5, %v549_v22, 0.0 }
 0x128   : > { %v342_v23 = vpop.f32.mrf.mxu0 }
 0x129   : > { %v550_v24 = vmul.f32 %v547_v19, %v342_v23  ;;  %v568_v25 = vsel %vm566_vm4, %v342_v23, -inf }
 0x12a   : > { %v570_v27 = vsel %vm551_vm5, %v568_v25, -inf  ;;  %v801_v9 = vpop.f32.mrf.mxu0 }
 0x12b   : > { %v553_v29 = vsel %vm551_vm5, %v550_v24, 0.0  ;;  %v571_v30 = vmax.f32 %v569_v26, %v570_v27 }
 0x12c   : > { %v554_v31 = vadd.f32 %v553_v29, %v552_v28 }
 0x12d   : > { %v572_v0 = vrot.slane %v571_v30, 4 }
 0x12e   : > { %v555_v32 = vrot.slane %v554_v31, 4 }
 0x12f   : > { %v573_v33 = vmax.f32 %v571_v30, %v572_v0 }
 0x130   : > { %v556_v34 = vadd.f32 %v555_v32, %v554_v31 }
 0x131   : > { %v574_v35 = vrot.slane %v573_v33, 2 }
 0x132   : > { %v557_v36 = vrot.slane %v556_v34, 2 }
 0x133   : > { %v575_v37 = vmax.f32 %v573_v33, %v574_v35 }
 0x134   : > { %v558_v38 = vadd.f32 %v557_v36, %v556_v34 }
 0x135   : > { %v576_v39 = vrot.slane %v575_v37, 1 }
 0x136   : > { %v559_v40 = vrot.slane %v558_v38, 1 }
 0x137   : > { %v577_v43 = vmax.f32 %v575_v37, %v576_v39 }
 0x138   : > { %v560_v44 = vadd.f32 %v559_v40, %v558_v38 }
 0x139   : > { %v578_v45 = vmax.f32 %v564_v41, %v577_v43 }
 0x13a   : > { %v561_v46 = vadd.f32 %v560_v44, %v548_v42 }
 0x13b   : > { %579 = vst.msk [vmem:[#allocation2] sm:$0x1] %vm281_vm2, %v578_v45 }
 0x13c   : > { %563 = vst.msk [vmem:[#allocation3] sm:$0x1] %vm281_vm2, %v561_v46 }
 0x142   : > { %v583_v49 = vld [vmem:[#allocation2] sm:$0x1] }
 0x143   : > { %v584_v47 = vld [vmem:[#allocation3] sm:$0x1] }
 0x144   : > { %v585_v48 = vmul.f32 0.06666667, %v584_v47 }
 0x146   : > { %v586_v50 = vsub.f32 %v583_v49, %v585_v48 }
 0x148   : > { %587 = vst.msk [vmem:[%s274_s4] sm:$0x1] %vm281_vm2, %v586_v50 }
 0x149   : > { %1000 = shalt.err (!%p997_p0)
}
 0x14a   : > { %s1001_s2 = scalar_lea.hbm %s601_s11, 16  ;;  %s1005_s21 = scalar_lea.hbm %s1401_s3, 128 }
 0x14b   : > { %p1002_p2 = scmp.ne.s32.totalorder %s601_s11, %s1001_s2  ;;  %p1006_p9 = scmp.lt.s32.totalorder %s601_s11, %s1401_s3 }
 0x14c   : > { %p1007_p11 = scmp.lt.s32.totalorder %s1005_s21, %s1001_s2 }
 0x14d   : > { %p1003_p6 = pnand %p1002_p2, %p1208_p12 }
 0x14e   : > { %p1008_p10 = por %p1007_p11, %p1006_p9 }
 0x14f   : > { %p1004_p7 = pneg %p1003_p6 }
 0x151   : > { %p1009_p1 = pnand %p1008_p10, %p1004_p7 }
 0x153   : > { %1012 = shalt.err (!%p1009_p1)
}
 0x154   : > { %810 = dma.vmem_to_hbm [thread:$0]  (%p1208_p12), %s604_s25, 16, %s601_s11, %s589_s28  }
 0x155 PF: > { %s1424_s27 = sld [smem:[#allocation17_spill]]  ;;  %p830_p4 = scmp.ge.s32.totalorder %s1091_s19, 2 }
 0x156   : > { %s615_s30 = sand.u32 1, %s1063_s12  }
 0x157   : > { %s616_s0 = scalar_lea.sflag [#allocation6], %s615_s30 }
 0x15b   : > { %p1425_p8 = scmp.ne.s32.totalorder %s1424_s27, 0 }
 0x15d   : > { %p824_p3 = pnand %p830_p4, %p1425_p8 }
 0x15f   : > { %p825_p5 = pneg %p824_p3 }
 0x161   : > { %1058 = dma.done.wait (%p825_p5), %s616_s0, 16  }
 0x162   : > { %1060 = vsyncadd (%p825_p5), %s616_s0, 4294967280  ;;  %s22_s19 = sadd.s32 1, %s1091_s19   ;;  %s1426_s17 = sld [smem:[#allocation20_spill]] }
 0x163   : > { %p19_p13 = scmp.ge.s32.totalorder %s22_s19, 10   ;;  %s1427_s15 = sld [smem:[#allocation15_spill]] }
 0x164   : > { %s1428_s16 = sld [smem:[#allocation16_spill]]  ;;  %s1431_s12 = smov %s1067_s13 }
 0x165   : > { %s1429_s9 = sld [smem:[#allocation18_spill]]  ;;  %s1432_s13 = smov %s1071_s14 }
 0x166   : > { %s1430_s18 = sld [smem:[#allocation19_spill]] }
 0x167   :  { %21 = sbr.rel (!%p19_p13) target bundleno = 12 (0xc), region = 102 }
 0x168   : > { %s1433_s14 = smov %s1426_s17 }
 0x16b   : > { %s1434_s17 = smov %s1429_s9 }
 0x16c   :  { %620 = vsyncpa [#allocation5], 1 }
 0x16d   :  { %622 = vsyncpa [#allocation5 + $0x1], 1 }
 0x16e   :  { %623 = vsyncpa [#allocation8], 1 }
 0x16f   :  { %625 = vsyncpa [#allocation8 + $0x1], 1 }
 0x170   :  { %626 = vsyncpa [#allocation6], 1 }
 0x171   :  { %628 = vsyncpa [#allocation6 + $0x1], 1 }

</bundles_post_ra>
